<compile_context>
chip_gen: v7x
topology: tpu7x:2x2x1
jax: 0.10.0
libtpu: 0.0.40
codegen_flags: <defaults>
</compile_context>

<pallas_src>
import jax
import jax.numpy as jnp
from jax.experimental import pallas as pl
from jax.experimental.pallas import tpu as pltpu


def _round_up(x, m):
    return ((x + m - 1) // m) * m


def _cdiv(a, b):
    return -(-a // b)


def _reparam_kernel(mu_f_ref, lv_f_ref, eps_f_ref,
                    mu_o_ref, lv_o_ref, eps_o_ref,
                    z_f_ref, z_o_ref):
    """z = mu + eps * exp(0.5 * logvar) for both (fundus, oct) pairs."""
    mu_f = mu_f_ref[...].astype(jnp.float32)
    std_f = jnp.exp(0.5 * lv_f_ref[...].astype(jnp.float32))          # EUP
    z_f_ref[...] = (mu_f + eps_f_ref[...].astype(jnp.float32) * std_f).astype(z_f_ref.dtype)

    mu_o = mu_o_ref[...].astype(jnp.float32)
    std_o = jnp.exp(0.5 * lv_o_ref[...].astype(jnp.float32))
    z_o_ref[...] = (mu_o + eps_o_ref[...].astype(jnp.float32) * std_o).astype(z_o_ref.dtype)


def latent_combiner_forward(mu_fundus, logvar_fundus, mu_oct, logvar_oct, seed,
                            max_block_rows=2048,
                            vmem_budget_bytes=16 * 1024 * 1024):
    """Pallas implementation of LatentCombiner.forward.

    `seed` drives the eps draw (same seed -> same eps); the PyTorch reference
    uses torch.randn_like, i.e. an arbitrary fresh N(0,1) draw.
    Returns [z_fundus, z_oct].
    """
    assert mu_fundus.shape == logvar_fundus.shape
    assert mu_oct.shape == logvar_oct.shape
    assert mu_fundus.shape[0] == mu_oct.shape[0]
    b, d_f = mu_fundus.shape
    d_o = mu_oct.shape[1]
    d_total = d_f + d_o
    out_dtype = mu_fundus.dtype

    # eps drawn on the host-side JAX PRNG (portable; the on-chip pltpu PRNG
    # has no CPU/interpret lowering). Costs one extra read stream per pair.
    key = jax.random.PRNGKey(seed)
    k_f, k_o = jax.random.split(key)
    eps_f = jax.random.normal(k_f, mu_fundus.shape, dtype=out_dtype)
    eps_o = jax.random.normal(k_o, mu_oct.shape, dtype=out_dtype)

    # Block-row sizing:
    #   * VMEM budget counts the 8 pipeline buffers (6 in + 2 out) double
    #     buffered at the real dtype, plus ~4 block-sized f32 temporaries.
    #   * Balanced across grid steps so the ragged tail is at most 7 rows.
    #   * >= 2 grid steps when possible so the "parallel" axis shards across
    #     both v7x TensorCores.
    itemsize = jnp.dtype(out_dtype).itemsize
    per_row_bytes = 2 * 4 * d_total * itemsize + 4 * d_total * 4
    max_rows = max(8, min(max_block_rows, vmem_budget_bytes // per_row_bytes))
    steps = _cdiv(b, max_rows)
    if steps == 1 and b >= 16:
        steps = 2
    bm = _round_up(_cdiv(b, steps), 8)
    if bm >= b:
        bm = b  # single full-batch block (block dim == full array dim is allowed)
    num_blocks = _cdiv(b, bm)

    spec_f = pl.BlockSpec((bm, d_f), lambda i: (i, 0))
    spec_o = pl.BlockSpec((bm, d_o), lambda i: (i, 0))

    z_f, z_o = pl.pallas_call(
        _reparam_kernel,
        out_shape=(jax.ShapeDtypeStruct((b, d_f), out_dtype),
                   jax.ShapeDtypeStruct((b, d_o), out_dtype)),
        grid=(num_blocks,),
        in_specs=[spec_f, spec_f, spec_f, spec_o, spec_o, spec_o],
        out_specs=(spec_f, spec_o),
        compiler_params=pltpu.CompilerParams(
            dimension_semantics=("parallel",),
            vmem_limit_bytes=vmem_budget_bytes + (8 << 20),
        ),
    )(mu_fundus, logvar_fundus, eps_f, mu_oct, logvar_oct, eps_o)
    return [z_f, z_o]


def init_latent_combiner_params(latent_dim_fundus, latent_dim_oct, key):
    # TODO(synk): `fc` is constructed in the PyTorch __init__ but never applied
    # in forward(); it is initialized here only for parameter parity.
    dim = latent_dim_fundus + latent_dim_oct
    kw, kb = jax.random.split(key)
    bound = 1.0 / float(jnp.sqrt(jnp.float32(dim)))
    w = jax.random.uniform(kw, (dim, dim), minval=-bound, maxval=bound, dtype=jnp.float32)
    bb = jax.random.uniform(kb, (dim,), minval=-bound, maxval=bound, dtype=jnp.float32)
    return {"fc_w": w, "fc_b": bb}


def _eps_reference(seed, shape_f, shape_o, dtype):
    key = jax.random.PRNGKey(seed)
    k_f, k_o = jax.random.split(key)
    return (jax.random.normal(k_f, shape_f, dtype=dtype),
            jax.random.normal(k_o, shape_o, dtype=dtype))


if __name__ == "__main__":
    batch = 8
    d_f = 32
    d_o = 32

    key = jax.random.PRNGKey(0)
    k_params, k_mf, k_lf, k_mo, k_lo = jax.random.split(key, 5)
    params = init_latent_combiner_params(d_f, d_o, k_params)

    mu_fundus = jax.random.normal(k_mf, (batch, d_f), dtype=jnp.float32)
    logvar_fundus = jax.random.normal(k_lf, (batch, d_f), dtype=jnp.float32)
    mu_oct = jax.random.normal(k_mo, (batch, d_o), dtype=jnp.float32)
    logvar_oct = jax.random.normal(k_lo, (batch, d_o), dtype=jnp.float32)

    seed = 1234
    z_f, z_o = latent_combiner_forward(mu_fundus, logvar_fundus, mu_oct, logvar_oct, seed)
    jax.block_until_ready(z_f)
    jax.block_until_ready(z_o)

    assert z_f.shape == (batch, d_f) and z_o.shape == (batch, d_o)
    assert bool(jnp.all(jnp.isfinite(z_f))) and bool(jnp.all(jnp.isfinite(z_o)))

    # Exact reference check: recompute the same eps draw and apply the formula.
    eps_f_ref, eps_o_ref = _eps_reference(seed, mu_fundus.shape, mu_oct.shape, jnp.float32)
    ref_f = mu_fundus + eps_f_ref * jnp.exp(0.5 * logvar_fundus)
    ref_o = mu_oct + eps_o_ref * jnp.exp(0.5 * logvar_oct)
    assert jnp.allclose(z_f, ref_f, atol=1e-5, rtol=1e-5)
    assert jnp.allclose(z_o, ref_o, atol=1e-5, rtol=1e-5)

    # Determinism: same seed -> identical draw.
    z_f2, z_o2 = latent_combiner_forward(mu_fundus, logvar_fundus, mu_oct, logvar_oct, seed)
    assert bool(jnp.array_equal(z_f, z_f2)) and bool(jnp.array_equal(z_o, z_o2))

    # std -> 0 (logvar very negative) implies z == mu.
    neg_f = jnp.full_like(logvar_fundus, -120.0)
    neg_o = jnp.full_like(logvar_oct, -120.0)
    z_f0, z_o0 = latent_combiner_forward(mu_fundus, neg_f, mu_oct, neg_o, seed)
    assert jnp.allclose(z_f0, mu_fundus, atol=1e-5, rtol=1e-5)
    assert jnp.allclose(z_o0, mu_oct, atol=1e-5, rtol=1e-5)

    # Multi-block + ragged-batch + uneven latent dims path (grid of 3, last block partial).
    b2, da, db = 20, 16, 48
    k1, k2, k3, k4 = jax.random.split(k_params, 4)
    mu_a = jax.random.normal(k1, (b2, da), dtype=jnp.float32)
    lv_a = jax.random.normal(k2, (b2, da), dtype=jnp.float32)
    mu_b = jax.random.normal(k3, (b2, db), dtype=jnp.float32)
    lv_b = jax.random.normal(k4, (b2, db), dtype=jnp.float32)
    z_a, z_b = latent_combiner_forward(mu_a, lv_a, mu_b, lv_b, seed, max_block_rows=8)
    eps_a_ref, eps_b_ref = _eps_reference(seed, mu_a.shape, mu_b.shape, jnp.float32)
    assert z_a.shape == (b2, da) and z_b.shape == (b2, db)
    assert jnp.allclose(z_a, mu_a + eps_a_ref * jnp.exp(0.5 * lv_a), atol=1e-5, rtol=1e-5)
    assert jnp.allclose(z_b, mu_b + eps_b_ref * jnp.exp(0.5 * lv_b), atol=1e-5, rtol=1e-5)

    print("KERNEL_OK")
</pallas_src>

<mosaic_0001>
module attributes {stable_mosaic.version = 11 : i64} {
  func.func @_reparam_kernel(%arg0: i32, %arg1: memref<8x32xf32, #tpu.memory_space<vmem>>, %arg2: memref<8x32xf32, #tpu.memory_space<vmem>>, %arg3: memref<8x32xf32, #tpu.memory_space<vmem>>, %arg4: memref<8x32xf32, #tpu.memory_space<vmem>>, %arg5: memref<8x32xf32, #tpu.memory_space<vmem>>, %arg6: memref<8x32xf32, #tpu.memory_space<vmem>>, %arg7: memref<8x32xf32, #tpu.memory_space<vmem>>, %arg8: memref<8x32xf32, #tpu.memory_space<vmem>>) attributes {dimension_semantics = [#tpu.dimension_semantics<parallel>], iteration_bounds = array<i64: 1>, scalar_prefetch = 0 : i64, scratch_operands = 0 : i64, tpu.core_type = #tpu.core_type<tc>, window_params = [{transform_indices = @transform_0, window_bounds = array<i64: 8, 32>}, {transform_indices = @transform_1, window_bounds = array<i64: 8, 32>}, {transform_indices = @transform_2, window_bounds = array<i64: 8, 32>}, {transform_indices = @transform_3, window_bounds = array<i64: 8, 32>}, {transform_indices = @transform_4, window_bounds = array<i64: 8, 32>}, {transform_indices = @transform_5, window_bounds = array<i64: 8, 32>}, {transform_indices = @transform_6, window_bounds = array<i64: 8, 32>}, {transform_indices = @transform_7, window_bounds = array<i64: 8, 32>}]} {
    %c0 = arith.constant 0 : index
    %c0_0 = arith.constant 0 : index
    %0 = vector.load %arg1[%c0, %c0_0] : memref<8x32xf32, #tpu.memory_space<vmem>>, vector<8x32xf32>
    %c0_1 = arith.constant 0 : index
    %c0_2 = arith.constant 0 : index
    %1 = vector.load %arg2[%c0_1, %c0_2] : memref<8x32xf32, #tpu.memory_space<vmem>>, vector<8x32xf32>
    %cst = arith.constant 5.000000e-01 : f32
    %2 = vector.broadcast %cst : f32 to vector<8x32xf32>
    %3 = arith.mulf %2, %1 : vector<8x32xf32>
    %4 = math.exp %3 : vector<8x32xf32>
    %c0_3 = arith.constant 0 : index
    %c0_4 = arith.constant 0 : index
    %5 = vector.load %arg3[%c0_3, %c0_4] : memref<8x32xf32, #tpu.memory_space<vmem>>, vector<8x32xf32>
    %6 = arith.mulf %5, %4 : vector<8x32xf32>
    %7 = arith.addf %0, %6 : vector<8x32xf32>
    %c0_5 = arith.constant 0 : index
    %c0_6 = arith.constant 0 : index
    %8 = vector.load %arg7[%c0_5, %c0_6] : memref<8x32xf32, #tpu.memory_space<vmem>>, vector<8x32xf32>
    tpu.vector_store %arg7[%c0_5, %c0_6], %7 {strides = array<i32>} : memref<8x32xf32, #tpu.memory_space<vmem>>, vector<8x32xf32>,
    %c0_7 = arith.constant 0 : index
    %c0_8 = arith.constant 0 : index
    %9 = vector.load %arg4[%c0_7, %c0_8] : memref<8x32xf32, #tpu.memory_space<vmem>>, vector<8x32xf32>
    %c0_9 = arith.constant 0 : index
    %c0_10 = arith.constant 0 : index
    %10 = vector.load %arg5[%c0_9, %c0_10] : memref<8x32xf32, #tpu.memory_space<vmem>>, vector<8x32xf32>
    %cst_11 = arith.constant 5.000000e-01 : f32
    %11 = vector.broadcast %cst_11 : f32 to vector<8x32xf32>
    %12 = arith.mulf %11, %10 : vector<8x32xf32>
    %13 = math.exp %12 : vector<8x32xf32>
    %c0_12 = arith.constant 0 : index
    %c0_13 = arith.constant 0 : index
    %14 = vector.load %arg6[%c0_12, %c0_13] : memref<8x32xf32, #tpu.memory_space<vmem>>, vector<8x32xf32>
    %15 = arith.mulf %14, %13 : vector<8x32xf32>
    %16 = arith.addf %9, %15 : vector<8x32xf32>
    %c0_14 = arith.constant 0 : index
    %c0_15 = arith.constant 0 : index
    %17 = vector.load %arg8[%c0_14, %c0_15] : memref<8x32xf32, #tpu.memory_space<vmem>>, vector<8x32xf32>
    tpu.vector_store %arg8[%c0_14, %c0_15], %16 {strides = array<i32>} : memref<8x32xf32, #tpu.memory_space<vmem>>, vector<8x32xf32>,
    return
  }
  func.func @transform_0(%arg0: i32) -> (i32, i32) {
    %c0_i32 = arith.constant 0 : i32
    %c0_i32_0 = arith.constant 0 : i32
    return %arg0, %c0_i32 : i32, i32
  }
  func.func @transform_1(%arg0: i32) -> (i32, i32) {
    %c0_i32 = arith.constant 0 : i32
    %c0_i32_0 = arith.constant 0 : i32
    return %arg0, %c0_i32 : i32, i32
  }
  func.func @transform_2(%arg0: i32) -> (i32, i32) {
    %c0_i32 = arith.constant 0 : i32
    %c0_i32_0 = arith.constant 0 : i32
    return %arg0, %c0_i32 : i32, i32
  }
  func.func @transform_3(%arg0: i32) -> (i32, i32) {
    %c0_i32 = arith.constant 0 : i32
    %c0_i32_0 = arith.constant 0 : i32
    return %arg0, %c0_i32 : i32, i32
  }
  func.func @transform_4(%arg0: i32) -> (i32, i32) {
    %c0_i32 = arith.constant 0 : i32
    %c0_i32_0 = arith.constant 0 : i32
    return %arg0, %c0_i32 : i32, i32
  }
  func.func @transform_5(%arg0: i32) -> (i32, i32) {
    %c0_i32 = arith.constant 0 : i32
    %c0_i32_0 = arith.constant 0 : i32
    return %arg0, %c0_i32 : i32, i32
  }
  func.func @transform_6(%arg0: i32) -> (i32, i32) {
    %c0_i32 = arith.constant 0 : i32
    %c0_i32_0 = arith.constant 0 : i32
    return %arg0, %c0_i32 : i32, i32
  }
  func.func @transform_7(%arg0: i32) -> (i32, i32) {
    %c0_i32 = arith.constant 0 : i32
    %c0_i32_0 = arith.constant 0 : i32
    return %arg0, %c0_i32 : i32, i32
  }
}

</mosaic_0001>

<bundles_post_ra>
// kernel: tpu_custom_call.1
= control target key start
LH: loop header
LB: loop body
LE: loop exit
PB: predicated region body
PF: predicated region fallthrough
CT: control target
= control target key end

     0   :  { %13 = vsyncpa [#allocation3], 0  ;;  %s400_s0 = inlined_call_operand.hbm [shape: f32[8,32], index: 0, kind: input, shape index: {}]   ;;  %s401_s1 = inlined_call_operand.hbm [shape: f32[8,32], index: 1, kind: input, shape index: {}]   ;;  %s402_s2 = inlined_call_operand.hbm [shape: f32[8,32], index: 2, kind: input, shape index: {}]   ;;  %s403_s3 = inlined_call_operand.vmem [shape: f32[8,32], index: 3, kind: input, shape index: {}]   ;;  %s404_s4 = inlined_call_operand.hbm [shape: f32[8,32], index: 4, kind: input, shape index: {}]   ;;  %s405_s5 = inlined_call_operand.vmem [shape: f32[8,32], index: 5, kind: input, shape index: {}]   ;;  %s406_s6 = inlined_call_operand.hbm [shape: f32[8,32], index: 6, kind: output, shape index: {0}]   ;;  %s407_s7 = inlined_call_operand.hbm [shape: f32[8,32], index: 7, kind: output, shape index: {1}]  }
   0x1   :  { %14 = vsyncpa [#allocation6], 0 }
   0x2   :  { %15 = vsyncpa [#allocation9], 0 }
   0x3   :  { %16 = vsyncpa [#allocation4], 0 }
   0x4   :  { %17 = vsyncpa [#allocation12], 0  ;;  %s276_s24 = smov [#allocation5]   ;;  %s277_s26 = smov [#allocation2]  }
   0x5   :  { %s34_s25 = sshll.u32 %s276_s24, 4  ;;  %s24_s27 = sshll.u32 %s277_s26, 4  ;;  %s35_s25 = int_to_ptr.vmem [resolvable:$true] %s34_s25  ;;  %s25_s27 = int_to_ptr.vmem [resolvable:$true] %s24_s27 }
   0x6   :  { %s134_s30 = scalar_lea.hbm %s401_s1, 128 }
   0x7   :  { %p135_p0 = scmp.ne.s32.totalorder %s401_s1, %s134_s30  ;;  %p138_p1 = scmp.lt.u32.totalorder %s134_s30, %s401_s1 }
   0x9   :  { %p140_p2 = pnand %p138_p1, %p135_p0 }
   0xb   :  { %143 = shalt.err (!%p140_p2)
}
   0xc   :  { %s144_s12 = scalar_lea.vmem %s35_s25, 128  ;;  %p149_p4 = scmp.lt.s32.totalorder %s35_s25, %s35_s25 }
   0xd   :  { %p145_p3 = scmp.ne.s32.totalorder %s35_s25, %s144_s12  ;;  %p150_p5 = scmp.lt.s32.totalorder %s144_s12, %s144_s12 }
   0xf   :  { %p151_p6 = por %p150_p5, %p149_p4 }
  0x11   :  { %p152_p7 = pnand %p151_p6, %p145_p3 }
  0x13   :  { %155 = shalt.err (!%p152_p7)
}
  0x14   :  { %37 = dma.hbm_to_vmem [thread:$0]  %s401_s1, 128, %s35_s25, [#allocation6]  }
  0x15   :  { %s156_s17 = scalar_lea.hbm %s400_s0, 128 }
  0x16   :  { %p157_p8 = scmp.ne.s32.totalorder %s400_s0, %s156_s17  ;;  %p160_p9 = scmp.lt.u32.totalorder %s156_s17, %s400_s0 }
  0x18   :  { %p162_p10 = pnand %p160_p9, %p157_p8 }
  0x1a   :  { %165 = shalt.err (!%p162_p10)
}
  0x1b   :  { %s166_s22 = scalar_lea.vmem %s25_s27, 128  ;;  %p171_p12 = scmp.lt.s32.totalorder %s25_s27, %s25_s27 }
  0x1c   :  { %p167_p11 = scmp.ne.s32.totalorder %s25_s27, %s166_s22  ;;  %p172_p13 = scmp.lt.s32.totalorder %s166_s22, %s166_s22 }
  0x1e   :  { %p173_p0 = por %p172_p13, %p171_p12 }
  0x20   :  { %p174_p1 = pnand %p173_p0, %p167_p11 }
  0x22   :  { %177 = shalt.err (!%p174_p1)
}
  0x23   :  { %27 = dma.hbm_to_vmem [thread:$0]  %s400_s0, 128, %s25_s27, [#allocation3]  }
  0x24   :  { %s278_s24 = smov [#allocation7]   ;;  %s279_s26 = smov [#allocation8]  }
  0x25   :  { %s44_s25 = sshll.u32 %s278_s24, 4  ;;  %s56_s28 = sshll.u32 %s279_s26, 4  ;;  %s45_s25 = int_to_ptr.vmem [resolvable:$true] %s44_s25  ;;  %s57_s28 = int_to_ptr.vmem [resolvable:$true] %s56_s28 }
  0x26   :  { %s178_s8 = scalar_lea.hbm %s402_s2, 128 }
  0x27   :  { %p179_p2 = scmp.ne.s32.totalorder %s402_s2, %s178_s8  ;;  %p182_p3 = scmp.lt.u32.totalorder %s178_s8, %s402_s2 }
  0x29   :  { %p184_p4 = pnand %p182_p3, %p179_p2 }
  0x2b   :  { %187 = shalt.err (!%p184_p4)
}
  0x2c   :  { %s188_s0 = scalar_lea.vmem %s45_s25, 128  ;;  %p193_p6 = scmp.lt.s32.totalorder %s45_s25, %s45_s25 }
  0x2d   :  { %p189_p5 = scmp.ne.s32.totalorder %s45_s25, %s188_s0  ;;  %p194_p7 = scmp.lt.s32.totalorder %s188_s0, %s188_s0 }
  0x2f   :  { %p195_p8 = por %p194_p7, %p193_p6 }
  0x31   :  { %p196_p9 = pnand %p195_p8, %p189_p5 }
  0x33   :  { %199 = shalt.err (!%p196_p9)
}
  0x34   :  { %47 = dma.hbm_to_vmem [thread:$0]  %s402_s2, 128, %s45_s25, [#allocation6]  }
  0x35   :  { %s200_s16 = scalar_lea.hbm %s404_s4, 128 }
  0x36   :  { %p201_p10 = scmp.ne.s32.totalorder %s404_s4, %s200_s16  ;;  %p204_p11 = scmp.lt.u32.totalorder %s200_s16, %s404_s4 }
  0x38   :  { %p206_p12 = pnand %p204_p11, %p201_p10 }
  0x3a   :  { %209 = shalt.err (!%p206_p12)
}
  0x3b   :  { %s210_s21 = scalar_lea.vmem %s57_s28, 128  ;;  %p215_p0 = scmp.lt.s32.totalorder %s57_s28, %s57_s28 }
  0x3c   :  { %p211_p13 = scmp.ne.s32.totalorder %s57_s28, %s210_s21  ;;  %p216_p1 = scmp.lt.s32.totalorder %s210_s21, %s210_s21 }
  0x3e   :  { %p217_p2 = por %p216_p1, %p215_p0 }
  0x40   :  { %p218_p3 = pnand %p217_p2, %p211_p13 }
  0x42   :  { %221 = shalt.err (!%p218_p3)
}
  0x43   :  { %59 = dma.hbm_to_vmem [thread:$0]  %s404_s4, 128, %s57_s28, [#allocation9]  }
  0x44   :  { %266 = dma.done.wait [#allocation3], 128  }
  0x45   :  { %267 = vsyncadd [#allocation3], 4294967168 }
  0x46   :  { %268 = dma.done.wait [#allocation6], 256  }
  0x47   :  { %269 = vsyncadd [#allocation6], 4294967040 }
  0x48   :  { %270 = dma.done.wait [#allocation9], 128  }
  0x49   :  { %271 = vsyncadd [#allocation9], 4294967168  ;;  %v75_v0 = vld [vmem:[#allocation5] sm:$0xff]  ;;  %v85_v2 = vld [vmem:[#allocation8] sm:$0xff]  ;;  %s280_s4 = smov [#allocation10]   ;;  %s281_s28 = smov [#allocation11]  }
  0x4a   :  { %v76_v1 = vmul.f32 0.5, %v75_v0  ;;  %v86_v3 = vmul.f32 0.5, %v85_v2  ;;  %v79_v6 = vld [vmem:[#allocation7] sm:$0xff]  ;;  %v89_v7 = vld [vmem:[%s405_s5] sm:$0xff]  ;;  %s99_s24 = sshll.u32 %s280_s4, 4  ;;  %s109_s29 = sshll.u32 %s281_s28, 4  ;;  %s100_s24 = int_to_ptr.vmem [resolvable:$true] %s99_s24  ;;  %s110_s29 = int_to_ptr.vmem [resolvable:$true] %s109_s29 }
  0x4b   :  { %v74_v9 = vld [vmem:[#allocation2] sm:$0xff]  ;;  %vm82_vm0 = vcmask 261120   ;;  %s222_s5 = scalar_lea.vmem %s100_s24, 128  ;;  %p227_p5 = scmp.lt.s32.totalorder %s100_s24, %s100_s24 }
  0x4c   :  { %v77_v4 = vmul.f32 1.442695, %v76_v1  ;;  %v87_v5 = vmul.f32 1.442695, %v86_v3  ;;  %v84_v12 = vld [vmem:[%s403_s3] sm:$0xff]  ;;  %p223_p4 = scmp.ne.s32.totalorder %s100_s24, %s222_s5  ;;  %p228_p6 = scmp.lt.s32.totalorder %s222_s5, %s222_s5 }
  0x4e   :  { %130 = vpow2.f32 %v77_v4  ;;  %p229_p7 = por %p228_p6, %p227_p5 }
  0x4f   :  { %132 = vpow2.f32 %v87_v5 }
  0x50   :  { %p230_p8 = pnand %p229_p7, %p223_p4 }
  0x58   :  { %v131_v8 = vpop.eup %130 }
  0x59   :  { %v133_v10 = vpop.eup %132  ;;  %v80_v11 = vmul.f32 %v131_v8, %v79_v6 }
  0x5a   :  { %v90_v13 = vmul.f32 %v133_v10, %v89_v7 }
  0x5b   :  { %v81_v14 = vadd.f32 %v80_v11, %v74_v9 }
  0x5c   :  { %v91_v15 = vadd.f32 %v90_v13, %v84_v12 }
  0x5d   :  { %83 = vst.msk [vmem:[#allocation10] sm:$0xff] %vm82_vm0, %v81_v14 }
  0x5e   :  { %92 = vst.msk [vmem:[#allocation11] sm:$0xff] %vm82_vm0, %v91_v15 }
  0x5f   :  { %233 = shalt.err (!%p230_p8)
}
  0x60   :  { %s234_s3 = scalar_lea.hbm %s406_s6, 128 }
  0x61   :  { %p235_p9 = scmp.ne.s32.totalorder %s406_s6, %s234_s3  ;;  %p238_p10 = scmp.lt.u32.totalorder %s234_s3, %s406_s6 }
  0x63   :  { %p240_p11 = pnand %p238_p10, %p235_p9 }
  0x65   :  { %243 = shalt.err (!%p240_p11)
}
  0x66   :  { %102 = dma.vmem_to_hbm [thread:$0]  %s100_s24, 128, %s406_s6, [#allocation4]  }
  0x67   :  { %s244_s13 = scalar_lea.vmem %s110_s29, 128  ;;  %p249_p13 = scmp.lt.s32.totalorder %s110_s29, %s110_s29 }
  0x68   :  { %p245_p12 = scmp.ne.s32.totalorder %s110_s29, %s244_s13  ;;  %p250_p0 = scmp.lt.s32.totalorder %s244_s13, %s244_s13 }
  0x6a   :  { %p251_p1 = por %p250_p0, %p249_p13 }
  0x6c   :  { %p252_p2 = pnand %p251_p1, %p245_p12 }
  0x6e   :  { %255 = shalt.err (!%p252_p2)
}
  0x6f   :  { %s256_s16 = scalar_lea.hbm %s407_s7, 128 }
  0x70   :  { %p257_p3 = scmp.ne.s32.totalorder %s407_s7, %s256_s16  ;;  %p260_p4 = scmp.lt.u32.totalorder %s256_s16, %s407_s7 }
  0x72   :  { %p262_p5 = pnand %p260_p4, %p257_p3 }
  0x74   :  { %265 = shalt.err (!%p262_p5)
}
  0x75   :  { %112 = dma.vmem_to_hbm [thread:$0]  %s110_s29, 128, %s407_s7, [#allocation12]  }
  0x76   :  { %272 = dma.done.wait [#allocation4], 128  }
  0x77   :  { %273 = vsyncadd [#allocation4], 4294967168 }
  0x78   :  { %274 = dma.done.wait [#allocation12], 128  }
  0x79   :  { %275 = vsyncadd [#allocation12], 4294967168 }
  0x7a   :  { %119 = vsyncpa [#allocation3], 1 }
  0x7b   :  { %120 = vsyncpa [#allocation6], 1 }
  0x7c   :  { %121 = vsyncpa [#allocation9], 1 }
  0x7d   :  { %122 = vsyncpa [#allocation4], 1 }
  0x7e   :  { %123 = vsyncpa [#allocation12], 1 }

</bundles_post_ra>
